<compile_context>
chip_gen: v7x
topology: tpu7x:2x2x1
jax: 0.10.0
libtpu: 0.0.40
codegen_flags: <defaults>
</compile_context>

<pallas_src>
import functools

import jax
import jax.numpy as jnp
from jax import lax
from jax.experimental import pallas as pl
from jax.experimental.pallas import tpu as pltpu


_NEG_LARGE = -1.0e9   # same fill value PyTorch's masked_fill uses; exp() -> 0.


def _round_up(n, m):
    return ((n + m - 1) // m) * m


def _vmem_budget_bytes():
    """~80% of this chip's physical VMEM (128 MiB v5e/v6e, 64 MiB v7x)."""
    cap = None
    try:
        cap = int(pltpu.get_tpu_info().vmem_capacity_bytes)
    except Exception:
        cap = None
    if not cap or cap <= 0:
        cap = 64 * 1024 * 1024          # conservative (v7x-sized) fallback
    return int(cap * 0.8)


def _shrink8(t):
    """Roughly halve a tile size while keeping it a positive multiple of 8."""
    return max(8, (t // 2) // 8 * 8)


def _tile(n, target):
    """Tile size: the (8-aligned) full extent if it is <= target, else target."""
    target = max(8, _round_up(target, 8))
    if n <= target:
        return _round_up(n, 8)
    return target


# ---------------------------------------------------------------------------
# Kernels
# ---------------------------------------------------------------------------

def _flash_kernel(q_ref, k_ref, v_ref, o_ref, qs_ref, m_ref, l_ref, acc_ref,
                  *, scale, qk_dtype, pv_dtype, tk, lk_valid, mask_k):
    """Online-softmax attention.  grid = (B*H, num_q_blocks, num_k_blocks)."""
    j = pl.program_id(2)

    @pl.when(j == 0)
    def _init():
        # Hoisted per-q-tile work: scale (and cast) q once, not once per k step.
        qs_ref[...] = (q_ref[0].astype(jnp.float32) * scale).astype(qk_dtype)
        m_ref[...] = jnp.full_like(m_ref, -jnp.inf)
        l_ref[...] = jnp.zeros_like(l_ref)
        acc_ref[...] = jnp.zeros_like(acc_ref)

    k = k_ref[0].astype(qk_dtype)               # (tk, Dk)
    v = v_ref[0]                                # (tk, Dv)

    # scores = (q * scale) @ k^T without materializing the transpose
    # (contract the last axes of both operands), accumulate in f32 on the MXU.
    s = lax.dot_general(qs_ref[...], k, (((1,), (1,)), ((), ())),
                        preferred_element_type=jnp.float32)   # (tq, tk) f32

    if mask_k:
        # Padded key columns (>= lk_valid) get -1e9 so exp() underflows to 0.
        col = j * tk + lax.broadcasted_iota(jnp.int32, s.shape, 1)
        s = jnp.where(col < lk_valid, s, _NEG_LARGE)

    m_prev = m_ref[...]
    m_new = jnp.maximum(m_prev, jnp.max(s, axis=-1, keepdims=True))
    alpha = jnp.exp(m_prev - m_new)
    p = jnp.exp(s - m_new)

    l_ref[...] = alpha * l_ref[...] + jnp.sum(p, axis=-1, keepdims=True)
    acc_ref[...] = alpha * acc_ref[...] + jnp.dot(
        p.astype(pv_dtype), v.astype(pv_dtype),
        preferred_element_type=jnp.float32)
    m_ref[...] = m_new

    @pl.when(j == pl.num_programs(2) - 1)
    def _finalize():
        # Exact normalization: tq divides per q tile, negligible cost and no
        # approximate-reciprocal error in the returned output.
        o_ref[0] = (acc_ref[...] / l_ref[...]).astype(o_ref.dtype)


def _attn_kernel(q_ref, k_ref, v_ref, o_ref, attn_ref, *, scale, pv_dtype):
    """Full-Lk softmax per q tile; also writes the attention matrix.

    QK^T and the softmax stay in the input dtype / f32 so the returned attn
    matrix keeps module parity; only the P@V matmul is (optionally) fed bf16.
    """
    q = q_ref[0] * scale                        # (tq, Dk), native dtype
    k = k_ref[0]                                # (Lk, Dk)
    v = v_ref[0]                                # (Lk, Dv)

    s = lax.dot_general(q, k, (((1,), (1,)), ((), ())),
                        preferred_element_type=jnp.float32)   # (tq, Lk) f32

    m = jnp.max(s, axis=-1, keepdims=True)
    e = jnp.exp(s - m)
    denom = jnp.sum(e, axis=-1, keepdims=True)
    p = e * (1.0 / denom)                       # exact softmax (tq divides only)

    o_ref[0] = jnp.dot(p.astype(pv_dtype), v.astype(pv_dtype),
                       preferred_element_type=jnp.float32).astype(o_ref.dtype)
    attn_ref[0] = p.astype(attn_ref.dtype)


# ---------------------------------------------------------------------------
# Wrapper
# ---------------------------------------------------------------------------

def scaled_dot_product_attention(q, k, v, temperature, mask=None,
                                 return_attn=True, q_block=512, k_block=1024,
                                 use_bf16_mxu=True, attn_dtype=None):
    """q: [B,H,Lq,Dk], k: [B,H,Lk,Dk], v: [B,H,Lk,Dv].

    return_attn=True  -> (output [B,H,Lq,Dv], attn [B,H,Lq,Lk])  (module parity)
    return_attn=False -> output only (flash path, no Lq x Lk HBM writeback)

    use_bf16_mxu=True feeds the MXU in bf16 (f32 accumulation) when the inputs
    are f32; set False for bit-faithful f32 matmuls.
    """
    if mask is not None:
        # TODO(synk): user mask support (masked_fill(-1e9) before softmax).
        raise NotImplementedError("mask is not supported in this kernel")

    B, H, Lq, Dk = q.shape
    Lk, Dv = v.shape[2], v.shape[3]
    BH = B * H
    scale = 1.0 / float(temperature)
    itemsize = jnp.dtype(q.dtype).itemsize
    out_dtype = q.dtype
    attn_dtype = out_dtype if attn_dtype is None else attn_dtype
    attn_itemsize = jnp.dtype(attn_dtype).itemsize

    # MXU feed dtypes (always accumulate in f32 via preferred_element_type).
    if use_bf16_mxu and q.dtype == jnp.float32:
        qk_dtype = jnp.bfloat16     # flash path QK^T operands
        pv_dtype = jnp.bfloat16     # probabilities / values for the P@V matmul
    else:
        qk_dtype = q.dtype
        pv_dtype = v.dtype

    vmem_budget = _vmem_budget_bytes()

    # Fuse batch and heads into one parallel grid axis.
    q3 = q.reshape(BH, Lq, Dk)
    k3 = k.reshape(BH, Lk, Dk)
    v3 = v.reshape(BH, Lk, Dv)

    # ---------------------------------------------------------------- attn ---
    if return_attn:
        tq = _tile(Lq, q_block)

        def _attn_resident_bytes(tq_):
            kv = 2 * Lk * (Dk + Dv) * itemsize            # double-buffered K/V
            qo = 2 * tq_ * (Dk + Dv) * itemsize           # double-buffered q + out
            attn_out = 2 * tq_ * Lk * attn_itemsize       # double-buffered attn block
            inter = 3 * tq_ * Lk * 4                      # s / e / p f32 intermediates
            return kv + qo + attn_out + inter

        # v7x (64 MiB VMEM) safety: shrink tq until the resident set fits.
        # TODO(synk): for extremely long Lk a tiled-Lk two-pass softmax would be
        #             needed; prefer return_attn=False there.
        while _attn_resident_bytes(tq) > int(0.85 * vmem_budget) and tq > 8:
            tq = _shrink8(tq)
        # Keep >= 2 parallel grid steps so both v7x TensorCores get work.
        if BH == 1:
            while _round_up(Lq, tq) // tq < 2 and tq > 8:
                tq = _shrink8(tq)

        Lq_pad = _round_up(Lq, tq)
        nq = Lq_pad // tq
        if Lq_pad != Lq:
            q3 = jnp.pad(q3, ((0, 0), (0, Lq_pad - Lq), (0, 0)))

        cost = pl.CostEstimate(
            flops=int(2 * BH * Lq_pad * Lk * (Dk + Dv)),
            transcendentals=int(BH * Lq_pad * Lk),
            bytes_accessed=int((q3.size + k3.size + v3.size
                                + BH * Lq_pad * Dv) * itemsize
                               + BH * Lq_pad * Lk * attn_itemsize))

        out3, attn3 = pl.pallas_call(
            functools.partial(_attn_kernel, scale=scale, pv_dtype=pv_dtype),
            out_shape=(
                jax.ShapeDtypeStruct((BH, Lq_pad, Dv), out_dtype),
                jax.ShapeDtypeStruct((BH, Lq_pad, Lk), attn_dtype),
            ),
            grid_spec=pltpu.PrefetchScalarGridSpec(
                num_scalar_prefetch=0,
                grid=(BH, nq),
                in_specs=[
                    pl.BlockSpec((1, tq, Dk), lambda b, i: (b, i, 0)),
                    pl.BlockSpec((1, Lk, Dk), lambda b, i: (b, 0, 0)),
                    pl.BlockSpec((1, Lk, Dv), lambda b, i: (b, 0, 0)),
                ],
                out_specs=[
                    pl.BlockSpec((1, tq, Dv), lambda b, i: (b, i, 0)),
                    pl.BlockSpec((1, tq, Lk), lambda b, i: (b, i, 0)),
                ],
            ),
            compiler_params=pltpu.CompilerParams(
                dimension_semantics=("parallel", "parallel"),
                vmem_limit_bytes=vmem_budget),
            cost_estimate=cost,
        )(q3, k3, v3)
        out = out3[:, :Lq, :].reshape(B, H, Lq, Dv)
        attn = attn3[:, :Lq, :].reshape(B, H, Lq, Lk)
        return out, attn

    # --------------------------------------------------------------- flash ---
    tq = _tile(Lq, q_block)
    tk = _tile(Lk, k_block)

    def _flash_resident_bytes(tq_, tk_):
        stream = 2 * (tq_ * (Dk + Dv) + tk_ * (Dk + Dv)) * itemsize  # dbl-buffered q/k/v/out
        scratch = (tq_ * Dk * jnp.dtype(qk_dtype).itemsize           # scaled-q scratch
                   + tq_ * (Dv + 2) * 4)                             # m / l / acc
        inter = 2 * tq_ * tk_ * 4                                    # s, p f32
        return stream + scratch + inter

    while _flash_resident_bytes(tq, tk) > int(0.85 * vmem_budget):
        if tk >= tq and tk > 8:
            tk = _shrink8(tk)
        elif tq > 8:
            tq = _shrink8(tq)
        else:
            break
    # Keep >= 2 parallel grid steps so both v7x TensorCores get work.
    if BH == 1:
        while _round_up(Lq, tq) // tq < 2 and tq > 8:
            tq = _shrink8(tq)

    Lq_pad = _round_up(Lq, tq)
    Lk_pad = _round_up(Lk, tk)
    nq = Lq_pad // tq
    nk = Lk_pad // tk
    if Lq_pad != Lq:
        q3 = jnp.pad(q3, ((0, 0), (0, Lq_pad - Lq), (0, 0)))
    if Lk_pad != Lk:
        k3 = jnp.pad(k3, ((0, 0), (0, Lk_pad - Lk), (0, 0)))
        v3 = jnp.pad(v3, ((0, 0), (0, Lk_pad - Lk), (0, 0)))

    kernel = functools.partial(
        _flash_kernel, scale=scale, qk_dtype=qk_dtype, pv_dtype=pv_dtype,
        tk=tk, lk_valid=Lk, mask_k=(Lk_pad != Lk))

    # K/V are streamed once per q tile (nq-fold re-read); q and out stream once.
    cost = pl.CostEstimate(
        flops=int(2 * BH * Lq_pad * Lk_pad * (Dk + Dv)),
        transcendentals=int(BH * Lq_pad * Lk_pad),
        bytes_accessed=int((q3.size + BH * Lq_pad * Dv
                            + nq * (k3.size + v3.size)) * itemsize))

    out3 = pl.pallas_call(
        kernel,
        out_shape=jax.ShapeDtypeStruct((BH, Lq_pad, Dv), out_dtype),
        grid_spec=pltpu.PrefetchScalarGridSpec(
            num_scalar_prefetch=0,
            grid=(BH, nq, nk),
            in_specs=[
                pl.BlockSpec((1, tq, Dk), lambda b, i, j: (b, i, 0)),
                pl.BlockSpec((1, tk, Dk), lambda b, i, j: (b, j, 0)),
                pl.BlockSpec((1, tk, Dv), lambda b, i, j: (b, j, 0)),
            ],
            out_specs=pl.BlockSpec((1, tq, Dv), lambda b, i, j: (b, i, 0)),
            scratch_shapes=[
                pltpu.VMEM((tq, Dk), qk_dtype),     # scaled q (hoisted per q tile)
                pltpu.VMEM((tq, 1), jnp.float32),   # running max m
                pltpu.VMEM((tq, 1), jnp.float32),   # running denom l
                pltpu.VMEM((tq, Dv), jnp.float32),  # running numerator acc
            ],
        ),
        compiler_params=pltpu.CompilerParams(
            dimension_semantics=("parallel", "parallel", "arbitrary"),
            vmem_limit_bytes=vmem_budget),
        cost_estimate=cost,
    )(q3, k3, v3)
    return out3[:, :Lq, :].reshape(B, H, Lq, Dv)


# ---------------------------------------------------------------------------
# Reference + self-test
# ---------------------------------------------------------------------------

def _reference(q, k, v, temperature):
    scores = jnp.einsum("bhqd,bhkd->bhqk", q, k, precision="highest") / temperature
    attn = jax.nn.softmax(scores, axis=-1)
    out = jnp.einsum("bhqk,bhkd->bhqd", attn, v, precision="highest")
    return out, attn


if __name__ == "__main__":
    B, H, L, D = 2, 4, 8, 32
    temperature = float(D) ** 0.5

    key = jax.random.PRNGKey(0)
    kq, kk, kv, kq2, kk2, kv2 = jax.random.split(key, 6)
    q = jax.random.normal(kq, (B, H, L, D), dtype=jnp.float32)
    k = jax.random.normal(kk, (B, H, L, D), dtype=jnp.float32)
    v = jax.random.normal(kv, (B, H, L, D), dtype=jnp.float32)
    ref_out, ref_attn = _reference(q, k, v, temperature)

    # 1) module-parity path, f32 MXU feed: tight-ish tolerance.
    out, attn = scaled_dot_product_attention(q, k, v, temperature,
                                             use_bf16_mxu=False)
    jax.block_until_ready((out, attn))
    assert jnp.allclose(attn, ref_attn, atol=2e-2, rtol=2e-2)
    assert jnp.allclose(out, ref_out, atol=2e-2, rtol=2e-2)

    # 2) module-parity path, default (bf16 P@V on the MXU): attn stays f32,
    #    output tolerance covers the bf16 feed of the probabilities / values.
    out_b, attn_b = scaled_dot_product_attention(q, k, v, temperature)
    jax.block_until_ready((out_b, attn_b))
    assert jnp.allclose(attn_b, ref_attn, atol=2e-2, rtol=2e-2)
    assert jnp.allclose(out_b, ref_out, atol=5e-2, rtol=5e-2)

    # 3) flash path (tiled Lq/Lk, online softmax, no attn writeback) with small
    #    blocks so the multi-k-tile accumulation is actually exercised.
    L2 = 128
    q2 = jax.random.normal(kq2, (1, 2, L2, D), dtype=jnp.float32)
    k2 = jax.random.normal(kk2, (1, 2, L2, D), dtype=jnp.float32)
    v2 = jax.random.normal(kv2, (1, 2, L2, D), dtype=jnp.float32)
    ref_out2, _ = _reference(q2, k2, v2, temperature)

    out2 = scaled_dot_product_attention(q2, k2, v2, temperature,
                                        return_attn=False,
                                        q_block=64, k_block=32)
    jax.block_until_ready(out2)
    assert jnp.allclose(out2, ref_out2, atol=5e-2, rtol=5e-2)

    out2_exact = scaled_dot_product_attention(q2, k2, v2, temperature,
                                              return_attn=False,
                                              q_block=64, k_block=32,
                                              use_bf16_mxu=False)
    jax.block_until_ready(out2_exact)
    assert jnp.allclose(out2_exact, ref_out2, atol=2e-2, rtol=2e-2)

    # 4) flash path on a length that is not a multiple of the block size:
    #    exercises Lq/Lk padding + key-column masking.
    L3 = 72
    q3 = jax.random.normal(kq2, (1, 2, L3, D), dtype=jnp.float32)
    k3 = jax.random.normal(kk2, (1, 2, L3, D), dtype=jnp.float32)
    v3 = jax.random.normal(kv2, (1, 2, L3, D), dtype=jnp.float32)
    ref_out3, _ = _reference(q3, k3, v3, temperature)
    out3 = scaled_dot_product_attention(q3, k3, v3, temperature,
                                        return_attn=False,
                                        q_block=64, k_block=32)
    jax.block_until_ready(out3)
    assert jnp.allclose(out3, ref_out3, atol=5e-2, rtol=5e-2)

    print("KERNEL_OK")
</pallas_src>

<mosaic_0001>
module attributes {stable_mosaic.version = 11 : i64} {
  func.func @_attn_kernel(%arg0: i32, %arg1: i32, %arg2: memref<1x8x32xf32, #tpu.memory_space<vmem>>, %arg3: memref<1x8x32xf32, #tpu.memory_space<vmem>>, %arg4: memref<1x8x32xf32, #tpu.memory_space<vmem>>, %arg5: memref<1x8x32xf32, #tpu.memory_space<vmem>>, %arg6: memref<1x8x8xf32, #tpu.memory_space<vmem>>) attributes {dimension_semantics = [#tpu.dimension_semantics<parallel>, #tpu.dimension_semantics<parallel>], iteration_bounds = array<i64: 8, 1>, scalar_prefetch = 0 : i64, scratch_operands = 0 : i64, tpu.core_type = #tpu.core_type<tc>, window_params = [{transform_indices = @transform_0, window_bounds = array<i64: 1, 8, 32>}, {transform_indices = @transform_1, window_bounds = array<i64: 1, 8, 32>}, {transform_indices = @transform_2, window_bounds = array<i64: 1, 8, 32>}, {transform_indices = @transform_3, window_bounds = array<i64: 1, 8, 32>}, {transform_indices = @transform_4, window_bounds = array<i64: 1, 8, 8>}]} {
    %c0 = arith.constant 0 : index
    %c0_0 = arith.constant 0 : index
    %c0_1 = arith.constant 0 : index
    %0 = vector.load %arg2[%c0, %c0_0, %c0_1] : memref<1x8x32xf32, #tpu.memory_space<vmem>>, vector<1x8x32xf32>
    %1 = vector.shape_cast %0 : vector<1x8x32xf32> to vector<8x32xf32>
    %cst = arith.constant 0.176776692 : f32
    %2 = vector.broadcast %cst : f32 to vector<8x32xf32>
    %3 = arith.mulf %1, %2 : vector<8x32xf32>
    %c0_2 = arith.constant 0 : index
    %c0_3 = arith.constant 0 : index
    %c0_4 = arith.constant 0 : index
    %4 = vector.load %arg3[%c0_2, %c0_3, %c0_4] : memref<1x8x32xf32, #tpu.memory_space<vmem>>, vector<1x8x32xf32>
    %5 = vector.shape_cast %4 : vector<1x8x32xf32> to vector<8x32xf32>
    %c0_5 = arith.constant 0 : index
    %c0_6 = arith.constant 0 : index
    %c0_7 = arith.constant 0 : index
    %6 = vector.load %arg4[%c0_5, %c0_6, %c0_7] : memref<1x8x32xf32, #tpu.memory_space<vmem>>, vector<1x8x32xf32>
    %7 = vector.shape_cast %6 : vector<1x8x32xf32> to vector<8x32xf32>
    %cst_8 = arith.constant dense<0.000000e+00> : vector<8x8xf32>
    %8 = tpu.matmul %3, %5, %cst_8 {dimension_numbers = #tpu.dot_dimension_numbers<[1], [1], [0], [0], [0, 0, 1, 0], [], []>} : vector<8x32xf32>, vector<8x32xf32>, vector<8x8xf32> -> vector<8x8xf32>
    %cst_9 = arith.constant dense<0xFF800000> : vector<8xf32>
    %9 = vector.multi_reduction <maximumf>, %8, %cst_9 [1] : vector<8x8xf32> to vector<8xf32>
    %10 = vector.shape_cast %9 : vector<8xf32> to vector<8x1xf32>
    %11 = vector.broadcast %10 : vector<8x1xf32> to vector<8x8xf32>
    %12 = arith.subf %8, %11 : vector<8x8xf32>
    %13 = math.exp %12 : vector<8x8xf32>
    %cst_10 = arith.constant dense<0.000000e+00> : vector<8xf32>
    %14 = vector.multi_reduction <add>, %13, %cst_10 [1] : vector<8x8xf32> to vector<8xf32>
    %15 = vector.shape_cast %14 : vector<8xf32> to vector<8x1xf32>
    %cst_11 = arith.constant 1.000000e+00 : f32
    %16 = vector.broadcast %cst_11 : f32 to vector<8x1xf32>
    %17 = arith.divf %16, %15 : vector<8x1xf32>
    %18 = vector.broadcast %17 : vector<8x1xf32> to vector<8x8xf32>
    %19 = arith.mulf %13, %18 : vector<8x8xf32>
    %cst_12 = arith.constant dense<0.000000e+00> : vector<8x32xf32>
    %20 = tpu.matmul %19, %7, %cst_12 {dimension_numbers = #tpu.dot_dimension_numbers<[1], [0], [0], [1], [0, 0, 1, 1], [], []>} : vector<8x8xf32>, vector<8x32xf32>, vector<8x32xf32> -> vector<8x32xf32>
    %c0_13 = arith.constant 0 : index
    %c0_14 = arith.constant 0 : index
    %c0_15 = arith.constant 0 : index
    %21 = vector.load %arg5[%c0_13, %c0_14, %c0_15] : memref<1x8x32xf32, #tpu.memory_space<vmem>>, vector<1x8x32xf32>
    %22 = vector.shape_cast %21 : vector<1x8x32xf32> to vector<8x32xf32>
    %23 = vector.shape_cast %20 : vector<8x32xf32> to vector<1x8x32xf32>
    tpu.vector_store %arg5[%c0_13, %c0_14, %c0_15], %23 {strides = array<i32>} : memref<1x8x32xf32, #tpu.memory_space<vmem>>, vector<1x8x32xf32>,
    %c0_16 = arith.constant 0 : index
    %c0_17 = arith.constant 0 : index
    %c0_18 = arith.constant 0 : index
    %24 = vector.load %arg6[%c0_16, %c0_17, %c0_18] : memref<1x8x8xf32, #tpu.memory_space<vmem>>, vector<1x8x8xf32>
    %25 = vector.shape_cast %24 : vector<1x8x8xf32> to vector<8x8xf32>
    %26 = vector.shape_cast %19 : vector<8x8xf32> to vector<1x8x8xf32>
    tpu.vector_store %arg6[%c0_16, %c0_17, %c0_18], %26 {strides = array<i32>} : memref<1x8x8xf32, #tpu.memory_space<vmem>>, vector<1x8x8xf32>,
    return
  }
  func.func @transform_0(%arg0: i32, %arg1: i32) -> (i32, i32, i32) {
    %c0_i32 = arith.constant 0 : i32
    %c0_i32_0 = arith.constant 0 : i32
    return %arg0, %arg1, %c0_i32 : i32, i32, i32
  }
  func.func @transform_1(%arg0: i32, %arg1: i32) -> (i32, i32, i32) {
    %c0_i32 = arith.constant 0 : i32
    %c0_i32_0 = arith.constant 0 : i32
    %c0_i32_1 = arith.constant 0 : i32
    return %arg0, %c0_i32, %c0_i32_0 : i32, i32, i32
  }
  func.func @transform_2(%arg0: i32, %arg1: i32) -> (i32, i32, i32) {
    %c0_i32 = arith.constant 0 : i32
    %c0_i32_0 = arith.constant 0 : i32
    %c0_i32_1 = arith.constant 0 : i32
    return %arg0, %c0_i32, %c0_i32_0 : i32, i32, i32
  }
  func.func @transform_3(%arg0: i32, %arg1: i32) -> (i32, i32, i32) {
    %c0_i32 = arith.constant 0 : i32
    %c0_i32_0 = arith.constant 0 : i32
    return %arg0, %arg1, %c0_i32 : i32, i32, i32
  }
  func.func @transform_4(%arg0: i32, %arg1: i32) -> (i32, i32, i32) {
    %c0_i32 = arith.constant 0 : i32
    %c0_i32_0 = arith.constant 0 : i32
    return %arg0, %arg1, %c0_i32 : i32, i32, i32
  }
}

</mosaic_0001>

<bundles_post_ra>
// kernel: tpu_custom_call.1
= control target key start
LH: loop header
LB: loop body
LE: loop exit
PB: predicated region body
PF: predicated region fallthrough
CT: control target
= control target key end

     0   :  { %s1334_s0 = inlined_call_operand.hbm [shape: f32[8,8,32], index: 0, kind: input, shape index: {}]   ;;  %s1335_s1 = inlined_call_operand.hbm [shape: f32[8,8,32], index: 1, kind: input, shape index: {}]   ;;  %s1336_s2 = inlined_call_operand.hbm [shape: f32[8,8,32], index: 2, kind: input, shape index: {}]   ;;  %s1337_s3 = inlined_call_operand.hbm [shape: f32[8,8,32], index: 3, kind: output, shape index: {0}]   ;;  %s1338_s4 = inlined_call_operand.hbm [shape: f32[8,8,8], index: 4, kind: output, shape index: {1}]  }
   0x1   :  { %1346 = sst [smem:[#allocation19_spill]] %s1335_s1 }
   0x2   :  { %10 = vsyncpa [#allocation3], 0 }
   0x3   :  { %12 = vsyncpa [#allocation3 + $0x1], 0 }
   0x4   :  { %13 = vsyncpa [#allocation6], 0 }
   0x5   :  { %15 = vsyncpa [#allocation6 + $0x1], 0 }
   0x6   :  { %16 = vsyncpa [#allocation4], 0 }
   0x7   :  { %18 = vsyncpa [#allocation4 + $0x1], 0 }
   0x8   :  { %19 = vsyncpa [#allocation10], 0 }
   0x9   :  { %21 = vsyncpa [#allocation10 + $0x1], 0  ;;  %s1037_s15 = smov 0   ;;  %s1039_s16 = smov 0  }
   0xa   :  { %s1041_s17 = smov 0   ;;  %s1043_s18 = smov 0  }
   0xb   :  { %s1045_s19 = smov 0   ;;  %s1047_s20 = smov 0  }
   0xc LB: > { %1347 = sst [smem:[#allocation15_spill]] %s999_s19  ;;  %s1068_s21 = sadd.s32 4294967295, %s1003_s20   ;;  %s1003_s20 = sphi %s1047_s20, %s27_s20   ;;  %s999_s19 = sphi %s1045_s19, %s1370_s19   ;;  %s995_s18 = sphi %s1043_s18, %s1369_s18   ;;  %s991_s17 = sphi %s1041_s17, %s1373_s17   ;;  %s987_s16 = sphi %s1039_s16, %s1372_s16   ;;  %s983_s15 = sphi %s1037_s15, %s1371_s15  }
   0xd   : > { %s674_s22 = sadd.s32 4294967294, %s1003_s20   ;;  %s39_s23 = sadd.s32 1, %s999_s19 }
   0xe   : > { %s48_s24 = sadd.s32 1, %s991_s17  ;;  %p41_p0 = scmp.ge.s32.totalorder %s39_s23, 8 }
   0xf   : > { %p55_p1 = scmp.ne.s32.totalorder %s991_s17, %s987_s16  ;;  %p56_p2 = scmp.eq.s32.totalorder %s1003_s20, 0 }
  0x10   : > { %p61_p3 = scmp.ne.s32.totalorder %s987_s16, %s983_s15  ;;  %s1375_s23 = smov (%p41_p0, %s39_s23), 0 }
  0x11   : > { %1348 = sst [smem:[#allocation16_spill]] %s1375_s23  ;;  %p1080_p4 = por %p56_p2, %p55_p1 }
  0x12   : > { %p62_p5 = scmp.eq.s32.totalorder %s1068_s21, 0  ;;  %s43_s26 = ssub.s32 %s999_s19, %s1375_s23 }
  0x13   : > { %p139_p6 = scmp.eq.s32.totalorder %s1068_s21, 7  ;;  %p46_p7 = scmp.eq.s32.totalorder %s43_s26, 0 }
  0x14   : > { %p1088_p8 = por %p62_p5, %p61_p3  ;;  %p145_p10 = scmp.eq.s32.totalorder %s674_s22, 7 }
  0x15   : > { %p1092_p9 = por %p139_p6, %p55_p1  ;;  %p739_p12 = scmp.lt.s32.totalorder %s1003_s20, 8 }
  0x16   : > { %s1350_s27 = scalar_select %p1088_p8, 1, 0 }
  0x17   : > { %s1351_s28 = scalar_select %p1092_p9, 1, 0 }
  0x18   : > { %s1097_s29 = scalar_select %p46_p7, %s991_s17, %s48_s24  }
  0x19   : > { %p1099_p11 = por %p145_p10, %p61_p3  ;;  %s1339_s5 = sand.u32 1, %s991_s17  }
  0x1a   : > { %1352 = sst [smem:[#allocation17_spill]] %s1097_s29  ;;  %s1107_s6 = sshll.u32 %s1339_s5, 3 }
  0x1b   : > { %s1353_s30 = scalar_select %p1099_p11, 1, 0 }
  0x1c   : > { %s1110_s7 = sshll.u32 %s999_s19, 7  ;;  %p1114_p13 = pnand %p739_p12, %p1080_p4 }
  0x1d   : > { %1354 = sst [smem:[#allocation18_spill]] %s1353_s30  ;;  %s212_s9 = sand.u32 1, %s1003_s20  }
  0x1e   : > { %s1355_s8 = scalar_select %p1114_p13, 1, 0 }
  0x1f   : > { %s1356_s1 = sld [smem:[#allocation19_spill]]  ;;  %s216_s13 = scalar_lea.vmem [#allocation5], %s1107_s6 }
  0x20   : > { %s223_s14 = sshll.u32 %s216_s13, 4  ;;  %s1130_s22 = scalar_lea.sflag [#allocation6], %s212_s9  ;;  %s1127_s14 = int_to_ptr.vmem [resolvable:$true] %s223_s14 }
  0x21   : > { %p1136_p3 = pneg %p1114_p13 }
  0x25   : > { %s1123_s12 = scalar_lea.hbm %s1356_s1, %s1110_s7  ;;  %s800_s11 = scalar_lea.hbm %s1356_s1, 1024 }
  0x26   : > { %s795_s24 = scalar_lea.hbm %s1123_s12, 128  ;;  %p801_p6 = scmp.lt.u32.totalorder %s1123_s12, %s1356_s1 }
  0x27   : > { %p796_p2 = scmp.ne.s32.totalorder %s1123_s12, %s795_s24  ;;  %p802_p7 = scmp.lt.u32.totalorder %s800_s11, %s795_s24 }
  0x28   : > { %p804_p12 = scmp.lt.u32.totalorder %s795_s24, %s1123_s12 }
  0x29   : > { %p798_p4 = pnand %p1136_p3, %p796_p2  ;;  %p803_p10 = por %p802_p7, %p801_p6 }
  0x2b   : > { %p799_p5 = pneg %p798_p4  ;;  %p805_p0 = por %p804_p12, %p803_p10 }
  0x2d   : > { %p806_p1 = pnand %p805_p0, %p799_p5 }
  0x2f   : > { %809 = shalt.err (!%p806_p1)
}
  0x30   : > { %s810_s9 = scalar_lea.vmem %s1127_s14, 128  ;;  %s1005_s26 = smov [#allocation5]  }
  0x31   : > { %p811_p2 = scmp.ne.s32.totalorder %s1127_s14, %s810_s9  ;;  %s815_s10 = sshll.u32 %s1005_s26, 4  ;;  %s816_s10 = int_to_ptr.vmem [resolvable:$false] %s815_s10 }
  0x32   : > { %s817_s5 = scalar_lea.vmem %s816_s10, 256  ;;  %p818_p9 = scmp.lt.s32.totalorder %s1127_s14, %s816_s10 }
  0x33   : > { %p813_p4 = pnand %p811_p2, %p1136_p3  ;;  %p819_p8 = scmp.lt.s32.totalorder %s817_s5, %s810_s9 }
  0x35   : > { %p814_p11 = pneg %p813_p4  ;;  %p820_p6 = por %p819_p8, %p818_p9 }
  0x37   : > { %p821_p7 = pnand %p820_p6, %p814_p11 }
  0x39   : > { %824 = shalt.err (!%p821_p7)
}
  0x3a   : > { %728 = dma.hbm_to_vmem [thread:$0]  (!%p1114_p13), %s1123_s12, 128, %s1127_s14, %s1130_s22  }
  0x3b   : > { %p1358_p0 = scmp.lt.s32.totalorder %s1003_s20, 9  ;;  %p1359_p1 = scmp.ge.s32.totalorder %s1003_s20, 1 }
  0x3c   : > { %s1172_s9 = scalar_lea.hbm %s1334_s0, %s1110_s7  ;;  %s197_s26 = scalar_lea.vmem [#allocation2], %s1107_s6 }
  0x3d   : > { %p1164_p5 = pnand %p1359_p1, %p1358_p0  ;;  %s205_s10 = sshll.u32 %s197_s26, 4  ;;  %s1175_s10 = int_to_ptr.vmem [resolvable:$true] %s205_s10 }
  0x3e   : > { %s1181_s5 = scalar_lea.hbm %s1336_s2, %s1110_s7  ;;  %s1361_s1 = sand.u32 1, %s991_s17  }
  0x3f   : > { %s1360_s24 = scalar_select %p1164_p5, 1, 0 }
  0x40   : > { %s194_s23 = scalar_lea.sflag [#allocation3], %s1361_s1  ;;  %s825_s19 = scalar_lea.hbm %s1172_s9, 128 }
  0x41   : > { %p826_p8 = scmp.ne.s32.totalorder %s1172_s9, %s825_s19  ;;  %s830_s29 = scalar_lea.hbm %s1334_s0, 1024 }
  0x42   : > { %p831_p10 = scmp.lt.u32.totalorder %s1172_s9, %s1334_s0  ;;  %p832_p12 = scmp.lt.u32.totalorder %s830_s29, %s825_s19 }
  0x43   : > { %p828_p9 = pnand %p826_p8, %p1136_p3  ;;  %p834_p4 = scmp.lt.u32.totalorder %s825_s19, %s1172_s9 }
  0x44   : > { %p833_p2 = por %p832_p12, %p831_p10 }
  0x45   : > { %p829_p11 = pneg %p828_p9 }
  0x46   : > { %p835_p6 = por %p834_p4, %p833_p2 }
  0x48   : > { %p836_p7 = pnand %p835_p6, %p829_p11 }
  0x4a   : > { %839 = shalt.err (!%p836_p7)
}
  0x4b   : > { %s840_s1 = scalar_lea.vmem %s1175_s10, 128  ;;  %s1006_s7 = smov [#allocation2]  }
  0x4c   : > { %p841_p0 = scmp.ne.s32.totalorder %s1175_s10, %s840_s1  ;;  %s845_s12 = sshll.u32 %s1006_s7, 4  ;;  %s846_s12 = int_to_ptr.vmem [resolvable:$false] %s845_s12 }
  0x4d   : > { %s847_s30 = scalar_lea.vmem %s846_s12, 256  ;;  %p848_p9 = scmp.lt.s32.totalorder %s1175_s10, %s846_s12 }
  0x4e   : > { %p843_p1 = pnand %p841_p0, %p1136_p3  ;;  %p849_p5 = scmp.lt.s32.totalorder %s847_s30, %s840_s1 }
  0x50   : > { %p844_p8 = pneg %p843_p1  ;;  %p850_p10 = por %p849_p5, %p848_p9 }
  0x52   : > { %p851_p12 = pnand %p850_p10, %p844_p8 }
  0x54   : > { %854 = shalt.err (!%p851_p12)
}
  0x55   : > { %725 = dma.hbm_to_vmem [thread:$0]  (!%p1114_p13), %s1172_s9, 128, %s1175_s10, %s194_s23  }
  0x56   : > { %s234_s19 = scalar_lea.vmem [#allocation7], %s1107_s6  ;;  %s855_s14 = scalar_lea.hbm %s1181_s5, 128 }
  0x57   : > { %s241_s29 = sshll.u32 %s234_s19, 4  ;;  %p856_p11 = scmp.ne.s32.totalorder %s1181_s5, %s855_s14  ;;  %s242_s29 = int_to_ptr.vmem [resolvable:$true] %s241_s29 }
  0x58   : > { %s860_s26 = scalar_lea.hbm %s1336_s2, 1024  ;;  %p861_p4 = scmp.lt.u32.totalorder %s1181_s5, %s1336_s2 }
  0x59   : > { %p858_p5 = pnand %p856_p11, %p1136_p3  ;;  %p862_p6 = scmp.lt.u32.totalorder %s860_s26, %s855_s14 }
  0x5a   : > { %p864_p0 = scmp.lt.u32.totalorder %s855_s14, %s1181_s5 }
  0x5b   : > { %p859_p2 = pneg %p858_p5  ;;  %p863_p7 = por %p862_p6, %p861_p4 }
  0x5d   : > { %p865_p1 = por %p864_p0, %p863_p7 }
  0x5f   : > { %p866_p8 = pnand %p865_p1, %p859_p2 }
  0x61   : > { %869 = shalt.err (!%p866_p8)
}
  0x62   : > { %s870_s23 = scalar_lea.vmem %s242_s29, 128  ;;  %s1007_s6 = smov [#allocation7]  }
  0x63   : > { %p871_p9 = scmp.ne.s32.totalorder %s242_s29, %s870_s23  ;;  %s875_s9 = sshll.u32 %s1007_s6, 4  ;;  %s876_s9 = int_to_ptr.vmem [resolvable:$false] %s875_s9 }
  0x64   : > { %s877_s10 = scalar_lea.vmem %s876_s9, 256  ;;  %p878_p11 = scmp.lt.s32.totalorder %s242_s29, %s876_s9 }
  0x65   : > { %p873_p10 = pnand %p871_p9, %p1136_p3  ;;  %p879_p5 = scmp.lt.s32.totalorder %s877_s10, %s870_s23 }
  0x67   : > { %p874_p12 = pneg %p873_p10  ;;  %p880_p13 = por %p879_p5, %p878_p11 }
  0x69   : > { %p881_p4 = pnand %p880_p13, %p874_p12 }
  0x6b   : > { %884 = shalt.err (!%p881_p4)
}
  0x6c   : > { %p1362_p6 = scmp.ne.s32.totalorder %s1355_s8, 0  ;;  %p1363_p2 = scmp.ne.s32.totalorder %s1360_s24, 0 }
  0x6d   : > { %s1228_s25 = sand.u32 (!%p1363_p2), 1, %s987_s16   ;;  %p1364_p13 = scmp.ne.s32.totalorder (!%p1363_p2), %s1350_s27, 0 }
  0x6e   : > { %731 = dma.hbm_to_vmem [thread:$0]  (!%p1362_p6), %s1181_s5, 128, %s242_s29, %s1130_s22  }
  0x6f   : > { %250 = sbr.rel (%p1363_p2) target bundleno = 880 (0x370), region = 32  ;;  %s1231_s12 = sshll.u32 (!%p1363_p2), %s1228_s25, 3 }
  0x70   : > { %s253_s30 = scalar_lea.sflag (!%p1363_p2), [#allocation3], %s1228_s25  ;;  %s256_s19 = scalar_lea.vmem (!%p1363_p2), [#allocation2], %s1231_s12 }
  0x76   : > { %966 = dma.done.wait (%p1364_p13), %s253_s30, 128  }
  0x77   : > { %968 = vsyncadd (%p1364_p13), %s253_s30, 4294967168  ;;  %s261_s8 = sand.u32 1, %s1068_s21   ;;  %s265_s24 = scalar_lea.vmem [#allocation5], %s1231_s12 }
  0x78   : > { %s262_s22 = scalar_lea.sflag [#allocation6], %s261_s8 }
  0x79   : > { %970 = dma.done.wait (%p1364_p13), %s262_s22, 256  }
  0x7a   : > { %972 = vsyncadd (%p1364_p13), %s262_s22, 4294967040  ;;  %v1008_v0 = vmov 0.0   ;;  %vm1009_vm0 = vmmov 0   ;;  %vm318_vm1 = vcmask 261120   ;;  %v316_v1 = vld [vmem:[%s265_s24] sm:$0xff]  ;;  %v314_v2 = vld [vmem:[%s256_s19] sm:$0xff] }
  0x7b   : > { %702 = vmatprep.subr.mxu0 %v1008_v0  ;;  %704 = vmatprep.mubr.msk.f32.mxu0 %vm1009_vm0, %v1008_v0  ;;  %v315_v3 = vmul.f32 0.17677669, %v314_v2  ;;  %vm395_vm2 = vcmask 64512   ;;  %s274_s21 = scalar_lea.vmem [#allocation7], %s1231_s12  ;;  %s313_s27 = scalar_lea.vmem [#allocation9], %s1231_s12 }
  0x7c   : > { %707 = vmatprep.subr.mxu1 %v1008_v0  ;;  %709 = vmatprep.mubr.msk.f32.mxu1 %vm1009_vm0, %v1008_v0  ;;  %v317_v12 = vld [vmem:[%s274_s21] sm:$0xff]  ;;  %s694_s5 = sshll.u32 %s995_s18, 7  ;;  %s517_s13 = sshll.u32 %s313_s27, 4  ;;  %s518_s13 = int_to_ptr.vmem [resolvable:$true] %s517_s13 }
  0x7d   : > { %703 = vmatpush3.xpose.msk.msra.mxu0 %vm318_vm1, %v316_v1  ;;  %708 = vmatpush3.msra.mxu1 %v317_v12  ;;  %s1259_s11 = scalar_lea.hbm %s1338_s4, %s694_s5  ;;  %s489_s26 = scalar_lea.sflag [#allocation10], %s1228_s25 }
  0x7e   : > { %s885_s1 = scalar_lea.vmem %s518_s13, 128  ;;  %p1365_p7 = scmp.ne.s32.totalorder %s1351_s28, 0 }
  0x7f   : > { %p886_p3 = scmp.ne.s32.totalorder %s518_s13, %s885_s1  ;;  %s1010_s7 = smov [#allocation9]  }
  0x80   : > { %705 = vmatmul.mubr.msk.f32.vlgmr.msra.gmra.mrb[0].mxu0 %vm318_vm1, %v315_v3  ;;  %s889_s23 = sshll.u32 %s1010_s7, 4  ;;  %s890_s23 = int_to_ptr.vmem [resolvable:$false] %s889_s23 }
  0x81   : > { %p887_p0 = pnand %p886_p3, %p1365_p7  ;;  %s891_s6 = scalar_lea.vmem %s890_s23, 256 }
  0x82   : > { %p892_p8 = scmp.lt.s32.totalorder %s518_s13, %s890_s23  ;;  %p893_p9 = scmp.lt.s32.totalorder %s891_s6, %s885_s1 }
  0x83   : > { %p888_p1 = pneg %p887_p0 }
  0x84   : > { %p894_p10 = por %p893_p9, %p892_p8 }
  0x86   : > { %p895_p12 = pnand %p894_p10, %p888_p1 }
 0x153   : > { %v391_v4 = vpop.f32.mrb[0].mxu0 }
 0x154   : > { %v706_v5 = vpop.f32.mrb[1].mxu0  ;;  %v396_v6 = vsel %vm395_vm2, %v391_v4, -inf }
 0x155   : > { %397 = vmax.xlane.f32.xlu0 %v396_v6 }
 0x1e2   : > { %v398_v7 = vpop.xlane.xlu0 %397 }
 0x1e3   : > { %v399_v8 = vsub.f32 %v391_v4, %v398_v7 }
 0x1e5   : > { %v400_v9 = vmul.f32 1.442695, %v399_v8 }
 0x1e7   : > { %791 = vpow2.f32 %v400_v9 }
 0x1f1   : > { %v792_v10 = vpop.eup %791 }
 0x1f2   : > { %v402_v11 = vsel %vm395_vm2, %v792_v10, 0.0 }
 0x1f3   : > { %403 = vadd.xlane.f32.xlu0 %v402_v11 }
 0x280   : > { %v404_v13 = vpop.xlane.xlu0 %403 }
 0x281   : > { %793 = vrcp.f32 %v404_v13 }
 0x28b   : > { %v794_v14 = vpop.eup %793 }
 0x28c   : > { %v407_v15 = vmul.f32 %v794_v14, %v792_v10 }
 0x28e   : > { %710 = vmatmul.mubr.msk.f32.vlgmr.msra.gmra.mrb[0].mxu1 %vm395_vm2, %v407_v15  ;;  %482 = vst.msk [vmem:[%s313_s27] sm:$0xff] %vm395_vm2, %v407_v15 }
 0x28f   : > { %898 = shalt.err (!%p895_p12)
}
 0x290   : > { %s899_s9 = scalar_lea.hbm %s1259_s11, 128  ;;  %s903_s19 = scalar_lea.hbm %s1338_s4, 1024 }
 0x291   : > { %p900_p11 = scmp.ne.s32.totalorder %s1259_s11, %s899_s9  ;;  %p904_p6 = scmp.lt.u32.totalorder %s1259_s11, %s1338_s4 }
 0x292   : > { %p905_p2 = scmp.lt.u32.totalorder %s903_s19, %s899_s9  ;;  %p907_p3 = scmp.lt.u32.totalorder %s899_s9, %s1259_s11 }
 0x293   : > { %p901_p5 = pnand %p900_p11, %p1365_p7 }
 0x294   : > { %p906_p13 = por %p905_p2, %p904_p6 }
 0x295   : > { %p902_p4 = pneg %p901_p5 }
 0x296   : > { %p908_p0 = por %p907_p3, %p906_p13 }
 0x298   : > { %p909_p1 = pnand %p908_p0, %p902_p4 }
 0x29a   : > { %912 = shalt.err (!%p909_p1)
}
 0x29b   : > { %719 = dma.vmem_to_hbm [thread:$0]  (%p1365_p7), %s518_s13, 128, %s1259_s11, %s489_s26  }
 0x29c   : > { %s306_s24 = scalar_lea.vmem [#allocation8], %s1231_s12  ;;  %s1285_s14 = scalar_lea.hbm %s1337_s3, %s694_s5 }
 0x29d   : > { %s503_s21 = sshll.u32 %s306_s24, 4  ;;  %s484_s1 = scalar_lea.sflag [#allocation4], %s1228_s25  ;;  %s1287_s21 = int_to_ptr.vmem [resolvable:$true] %s503_s21 }
 0x29e   : > { %s913_s7 = scalar_lea.vmem %s1287_s21, 128  ;;  %s1011_s18 = smov [#allocation8]  }
 0x29f   : > { %p914_p8 = scmp.ne.s32.totalorder %s1287_s21, %s913_s7  ;;  %s917_s12 = sshll.u32 %s1011_s18, 4  ;;  %s918_s12 = int_to_ptr.vmem [resolvable:$false] %s917_s12 }
 0x2a0   : > { %s919_s5 = scalar_lea.vmem %s918_s12, 256  ;;  %p920_p12 = scmp.lt.s32.totalorder %s1287_s21, %s918_s12 }
 0x2a1   : > { %p915_p9 = pnand %p914_p8, %p1365_p7  ;;  %p921_p11 = scmp.lt.s32.totalorder %s919_s5, %s913_s7 }
 0x2a3   : > { %p916_p10 = pneg %p915_p9  ;;  %p922_p5 = por %p921_p11, %p920_p12 }
 0x2a5   : > { %p923_p4 = pnand %p922_p5, %p916_p10 }
 0x361   : > { %v477_v16 = vpop.f32.mrb[0].mxu1 }
 0x362   : > { %481 = vst.msk [vmem:[%s306_s24] sm:$0xff] %vm318_vm1, %v477_v16  ;;  %v711_v17 = vpop.f32.mrb[1].mxu1 }
 0x363   : > { %926 = shalt.err (!%p923_p4)
}
 0x364   : > { %s927_s25 = scalar_lea.hbm %s1285_s14, 128  ;;  %s931_s26 = scalar_lea.hbm %s1337_s3, 1024 }
 0x365   : > { %p928_p6 = scmp.ne.s32.totalorder %s1285_s14, %s927_s25  ;;  %p932_p3 = scmp.lt.u32.totalorder %s1285_s14, %s1337_s3 }
 0x366   : > { %p933_p0 = scmp.lt.u32.totalorder %s931_s26, %s927_s25  ;;  %p935_p8 = scmp.lt.u32.totalorder %s927_s25, %s1285_s14 }
 0x367   : > { %p929_p2 = pnand %p928_p6, %p1365_p7 }
 0x368   : > { %p934_p1 = por %p933_p0, %p932_p3 }
 0x369   : > { %p930_p13 = pneg %p929_p2 }
 0x36a   : > { %p936_p9 = por %p935_p8, %p934_p1 }
 0x36c   : > { %p937_p10 = pnand %p936_p9, %p930_p13 }
 0x36e   : > { %940 = shalt.err (!%p937_p10)
}
 0x36f   : > { %718 = dma.vmem_to_hbm [thread:$0]  (%p1365_p7), %s1287_s21, 128, %s1285_s14, %s484_s1  }
 0x370 PF: > { %s1366_s9 = sld [smem:[#allocation18_spill]]  ;;  %p740_p12 = scmp.ge.s32.totalorder %s1003_s20, 2 }
 0x371   : > { %s529_s10 = sand.u32 1, %s983_s15  }
 0x372   : > { %s530_s30 = scalar_lea.sflag [#allocation4], %s529_s10 }
 0x376   : > { %p1367_p11 = scmp.ne.s32.totalorder %s1366_s9, 0 }
 0x378   : > { %p733_p5 = pnand %p740_p12, %p1367_p11 }
 0x37a   : > { %974 = dma.done.wait (!%p733_p5), %s530_s30, 128  }
 0x37b   : > { %976 = vsyncadd (!%p733_p5), %s530_s30, 4294967168  ;;  %s539_s19 = scalar_lea.sflag [#allocation10], %s529_s10 }
 0x37c   : > { %978 = dma.done.wait (!%p733_p5), %s539_s19, 128  }
 0x37d   : > { %980 = vsyncadd (!%p733_p5), %s539_s19, 4294967168  ;;  %s27_s20 = sadd.s32 1, %s1003_s20   ;;  %s1368_s28 = sld [smem:[#allocation17_spill]] }
 0x37e   : > { %p24_p4 = scmp.ge.s32.totalorder %s27_s20, 10   ;;  %s1369_s18 = sld [smem:[#allocation15_spill]] }
 0x37f   : > { %s1370_s19 = sld [smem:[#allocation16_spill]]  ;;  %s1371_s15 = smov %s987_s16 }
 0x380   : > { %s1372_s16 = smov %s991_s17  ;;  %26 = sbr.rel (!%p24_p4) target bundleno = 12 (0xc), region = 118 }
 0x383   : > { %s1373_s17 = smov %s1368_s28 }
 0x387   :  { %544 = vsyncpa [#allocation3], 1 }
 0x388   :  { %546 = vsyncpa [#allocation3 + $0x1], 1 }
 0x389   :  { %547 = vsyncpa [#allocation6], 1 }
 0x38a   :  { %549 = vsyncpa [#allocation6 + $0x1], 1 }
 0x38b   :  { %550 = vsyncpa [#allocation4], 1 }
 0x38c   :  { %552 = vsyncpa [#allocation4 + $0x1], 1 }
 0x38d   :  { %553 = vsyncpa [#allocation10], 1 }
 0x38e   :  { %555 = vsyncpa [#allocation10 + $0x1], 1 }

</bundles_post_ra>
